<compile_context>
chip_gen: v7x
topology: tpu7x:2x2x1
jax: 0.10.0
libtpu: 0.0.40
codegen_flags: <defaults>
</compile_context>

<pallas_src>
import math

import numpy as np

import jax
import jax.numpy as jnp
from jax.experimental import pallas as pl
from jax.experimental.pallas import tpu as pltpu


# ----------------------------------------------------------------------------
# Pallas kernel: 3 fused matmuls (layer1, layer2, heads), one lane-dense output.
# ----------------------------------------------------------------------------
def _fused_actor_critic_kernel(
    obs_ref, w1_ref, b1_ref, w2_ref, b2_ref, wh_ref, bh_ref, out_ref
):
    # layer 1 (actor || critic columns fused): (B, obs_dim) @ (obs_dim, 2*h1)
    h = jnp.dot(obs_ref[...], w1_ref[...], preferred_element_type=jnp.float32)
    h = jnp.maximum(h + b1_ref[...], 0.0)

    # layer 2 (block-diagonal fused): (B, 2*h1) @ (2*h1, 2*h2)
    h = jnp.dot(h, w2_ref[...], preferred_element_type=jnp.float32)
    h = jnp.maximum(h + b2_ref[...], 0.0)

    # heads: [mu | L_flat | v | zero padding] in one 128-lane-dense slab
    out_ref[...] = (
        jnp.dot(h, wh_ref[...], preferred_element_type=jnp.float32) + bh_ref[...]
    )


def _vmem_spec():
    return pl.BlockSpec(memory_space=pltpu.MemorySpace.VMEM)


def mlp_actor_critic_forward(obs, fused_params, act_dim):
    """Forward matching MLPActorCritic.forward: returns (mu, cov, v)."""
    w1, b1, w2, b2, wh, bh = fused_params
    B = obs.shape[0]
    out_cols = wh.shape[1]
    n_L = act_dim * act_dim

    # TODO(synk): for large rollout batches, add a "parallel" batch grid axis
    # (blocks of a few hundred rows) so v7x's second TensorCore is used; at
    # B=8 a single ungridded invocation is fastest.
    out = pl.pallas_call(
        _fused_actor_critic_kernel,
        out_shape=jax.ShapeDtypeStruct((B, out_cols), jnp.float32),
        in_specs=[_vmem_spec() for _ in range(7)],
        out_specs=_vmem_spec(),
    )(obs, w1, b1, w2, b2, wh, bh)

    mu = out[:, :act_dim]
    L = out[:, act_dim : act_dim + n_L].reshape(B, act_dim, act_dim)
    v = out[:, act_dim + n_L]

    # tiny (B, act_dim, act_dim) covariance glue (L @ L^T + clamp)
    cov = jnp.clip(jnp.matmul(L, jnp.swapaxes(L, 1, 2)), 1e-6, 10.0)
    return mu, cov, v


# ----------------------------------------------------------------------------
# Parameter construction (mirrors nn.Linear default init + pi_tril zero/-0.5
# init), plus packing into the fused layout consumed by the kernel.
# ----------------------------------------------------------------------------
def init_params(key, obs_dim, act_dim, hidden_sizes):
    h1, h2 = hidden_sizes
    tril_size = act_dim * (act_dim + 1) // 2

    def linear(key, fan_in, fan_out):
        kw, kb = jax.random.split(key)
        bound = 1.0 / math.sqrt(fan_in)
        w = jax.random.uniform(kw, (fan_in, fan_out), jnp.float32, -bound, bound)
        b = jax.random.uniform(kb, (1, fan_out), jnp.float32, -bound, bound)
        return w, b

    keys = jax.random.split(key, 6)
    aw1, ab1 = linear(keys[0], obs_dim, h1)
    aw2, ab2 = linear(keys[1], h1, h2)
    wmu, bmu = linear(keys[2], h2, act_dim)

    # pi_tril: weights zero, bias zero except diagonal-position entries = -0.5
    wtr = jnp.zeros((h2, tril_size), jnp.float32)
    btr_np = np.zeros((1, tril_size), np.float32)
    for i in range(act_dim):
        idx = i * (i + 1) // 2 + i
        if idx < tril_size:
            btr_np[0, idx] = -0.5
    btr = jnp.asarray(btr_np)

    cw1, cb1 = linear(keys[3], obs_dim, h1)
    cw2, cb2 = linear(keys[4], h1, h2)
    wv, bv = linear(keys[5], h2, 1)

    return (aw1, ab1, aw2, ab2, wmu, bmu, wtr, btr, cw1, cb1, cw2, cb2, wv, bv)


def pack_params(params, obs_dim, act_dim, hidden_sizes):
    """Pack the 14 raw tensors into 6 fused tensors (3-matmul plan)."""
    h1, h2 = hidden_sizes
    (aw1, ab1, aw2, ab2, wmu, bmu, wtr, btr, cw1, cb1, cw2, cb2, wv, bv) = params
    tril_size = act_dim * (act_dim + 1) // 2
    n_L = act_dim * act_dim

    # layer 1: concat actor/critic output columns
    w1 = jnp.concatenate([aw1, cw1], axis=1)                 # (obs_dim, 2*h1)
    b1 = jnp.concatenate([ab1, cb1], axis=1)                 # (1, 2*h1)

    # layer 2: block-diagonal [aw2 0; 0 cw2]
    w2 = jnp.zeros((2 * h1, 2 * h2), jnp.float32)
    w2 = w2.at[:h1, :h2].set(aw2)
    w2 = w2.at[h1:, h2:].set(cw2)                            # (2*h1, 2*h2)
    b2 = jnp.concatenate([ab2, cb2], axis=1)                 # (1, 2*h2)

    # tril -> flattened-L scatter matrix (row-major, matches torch.tril_indices)
    rows, cols = np.tril_indices(act_dim)
    S_np = np.zeros((tril_size, n_L), np.float32)
    S_np[np.arange(tril_size), rows * act_dim + cols] = 1.0
    S = jnp.asarray(S_np)

    # heads: [mu (act_dim) | L_flat (act_dim^2) | v (1) | zero pad] -> 128 lanes
    total = act_dim + n_L + 1
    out_cols = max(128, ((total + 127) // 128) * 128)
    wh = jnp.zeros((2 * h2, out_cols), jnp.float32)
    wh = wh.at[:h2, :act_dim].set(wmu)
    wh = wh.at[:h2, act_dim : act_dim + n_L].set(wtr @ S)
    wh = wh.at[h2:, act_dim + n_L].set(wv[:, 0])

    diag_np = np.zeros((n_L,), np.float32)
    diag_np[np.arange(act_dim) * act_dim + np.arange(act_dim)] = 1e-6
    bh = jnp.zeros((1, out_cols), jnp.float32)
    bh = bh.at[0, :act_dim].set(bmu[0])
    bh = bh.at[0, act_dim : act_dim + n_L].set(btr[0] @ S + jnp.asarray(diag_np))
    bh = bh.at[0, act_dim + n_L].set(bv[0, 0])

    return (w1, b1, w2, b2, wh, bh)


# ----------------------------------------------------------------------------
# Pure-JAX reference (unfused) for a correctness check.
# ----------------------------------------------------------------------------
def reference_forward(obs, params, act_dim):
    (aw1, ab1, aw2, ab2, wmu, bmu, wtr, btr, cw1, cb1, cw2, cb2, wv, bv) = params
    hp = jax.lax.Precision.HIGHEST
    a = jnp.maximum(jnp.dot(obs, aw1, precision=hp) + ab1, 0.0)
    a = jnp.maximum(jnp.dot(a, aw2, precision=hp) + ab2, 0.0)
    mu = jnp.dot(a, wmu, precision=hp) + bmu
    tril = jnp.dot(a, wtr, precision=hp) + btr
    c = jnp.maximum(jnp.dot(obs, cw1, precision=hp) + cb1, 0.0)
    c = jnp.maximum(jnp.dot(c, cw2, precision=hp) + cb2, 0.0)
    v = (jnp.dot(c, wv, precision=hp) + bv)[:, 0]

    B = obs.shape[0]
    rows, cols = np.tril_indices(act_dim)
    L = jnp.zeros((B, act_dim, act_dim), jnp.float32)
    L = L.at[:, rows, cols].set(tril)
    diag = jnp.arange(act_dim)
    L = L.at[:, diag, diag].add(1e-6)
    cov = jnp.clip(jnp.matmul(L, jnp.swapaxes(L, 1, 2), precision=hp), 1e-6, 10.0)
    return mu, cov, v


if __name__ == "__main__":
    B, obs_dim, act_dim = 8, 16, 4
    hidden_sizes = (32, 32)

    key = jax.random.PRNGKey(0)
    k_params, k_obs = jax.random.split(key)

    params = init_params(k_params, obs_dim, act_dim, hidden_sizes)
    fused = pack_params(params, obs_dim, act_dim, hidden_sizes)
    obs = jax.random.normal(k_obs, (B, obs_dim), jnp.float32)

    fwd = jax.jit(mlp_actor_critic_forward, static_argnums=(2,))
    mu, cov, v = fwd(obs, fused, act_dim)
    jax.block_until_ready((mu, cov, v))

    assert mu.shape == (B, act_dim)
    assert cov.shape == (B, act_dim, act_dim)
    assert v.shape == (B,)
    assert bool(jnp.all(jnp.isfinite(mu)))
    assert bool(jnp.all(jnp.isfinite(cov)))
    assert bool(jnp.all(jnp.isfinite(v)))

    # correctness check against the unfused pure-JAX reference
    mu_r, cov_r, v_r = reference_forward(obs, params, act_dim)
    assert bool(jnp.allclose(mu, mu_r, atol=1e-3, rtol=1e-3))
    assert bool(jnp.allclose(cov, cov_r, atol=1e-3, rtol=1e-3))
    assert bool(jnp.allclose(v, v_r, atol=1e-3, rtol=1e-3))

    print("KERNEL_OK")
</pallas_src>

<mosaic_0001>
module attributes {stable_mosaic.version = 11 : i64} {
  func.func @_fused_actor_critic_kernel(%arg0: memref<8x16xf32, #tpu.memory_space<vmem>>, %arg1: memref<16x64xf32, #tpu.memory_space<vmem>>, %arg2: memref<1x64xf32, #tpu.memory_space<vmem>>, %arg3: memref<64x64xf32, #tpu.memory_space<vmem>>, %arg4: memref<1x64xf32, #tpu.memory_space<vmem>>, %arg5: memref<64x128xf32, #tpu.memory_space<vmem>>, %arg6: memref<1x128xf32, #tpu.memory_space<vmem>>, %arg7: memref<8x128xf32, #tpu.memory_space<vmem>>) attributes {dimension_semantics = [], scalar_prefetch = 0 : i64, scratch_operands = 0 : i64, tpu.core_type = #tpu.core_type<tc>} {
    %c0 = arith.constant 0 : index
    %c0_0 = arith.constant 0 : index
    %0 = vector.load %arg0[%c0, %c0_0] : memref<8x16xf32, #tpu.memory_space<vmem>>, vector<8x16xf32>
    %c0_1 = arith.constant 0 : index
    %c0_2 = arith.constant 0 : index
    %1 = vector.load %arg1[%c0_1, %c0_2] : memref<16x64xf32, #tpu.memory_space<vmem>>, vector<16x64xf32>
    %cst = arith.constant dense<0.000000e+00> : vector<8x64xf32>
    %2 = tpu.matmul %0, %1, %cst {dimension_numbers = #tpu.dot_dimension_numbers<[1], [0], [0], [1], [0, 0, 1, 1], [], []>} : vector<8x16xf32>, vector<16x64xf32>, vector<8x64xf32> -> vector<8x64xf32>
    %c0_3 = arith.constant 0 : index
    %c0_4 = arith.constant 0 : index
    %3 = vector.load %arg2[%c0_3, %c0_4] : memref<1x64xf32, #tpu.memory_space<vmem>>, vector<1x64xf32>
    %4 = vector.broadcast %3 : vector<1x64xf32> to vector<8x64xf32>
    %5 = arith.addf %2, %4 : vector<8x64xf32>
    %cst_5 = arith.constant 0.000000e+00 : f32
    %6 = vector.broadcast %cst_5 : f32 to vector<8x64xf32>
    %7 = arith.maximumf %5, %6 : vector<8x64xf32>
    %c0_6 = arith.constant 0 : index
    %c0_7 = arith.constant 0 : index
    %8 = vector.load %arg3[%c0_6, %c0_7] : memref<64x64xf32, #tpu.memory_space<vmem>>, vector<64x64xf32>
    %cst_8 = arith.constant dense<0.000000e+00> : vector<8x64xf32>
    %9 = tpu.matmul %7, %8, %cst_8 {dimension_numbers = #tpu.dot_dimension_numbers<[1], [0], [0], [1], [0, 0, 1, 1], [], []>} : vector<8x64xf32>, vector<64x64xf32>, vector<8x64xf32> -> vector<8x64xf32>
    %c0_9 = arith.constant 0 : index
    %c0_10 = arith.constant 0 : index
    %10 = vector.load %arg4[%c0_9, %c0_10] : memref<1x64xf32, #tpu.memory_space<vmem>>, vector<1x64xf32>
    %11 = vector.broadcast %10 : vector<1x64xf32> to vector<8x64xf32>
    %12 = arith.addf %9, %11 : vector<8x64xf32>
    %cst_11 = arith.constant 0.000000e+00 : f32
    %13 = vector.broadcast %cst_11 : f32 to vector<8x64xf32>
    %14 = arith.maximumf %12, %13 : vector<8x64xf32>
    %c0_12 = arith.constant 0 : index
    %c0_13 = arith.constant 0 : index
    %15 = vector.load %arg5[%c0_12, %c0_13] : memref<64x128xf32, #tpu.memory_space<vmem>>, vector<64x128xf32>
    %cst_14 = arith.constant dense<0.000000e+00> : vector<8x128xf32>
    %16 = tpu.matmul %14, %15, %cst_14 {dimension_numbers = #tpu.dot_dimension_numbers<[1], [0], [0], [1], [0, 0, 1, 1], [], []>} : vector<8x64xf32>, vector<64x128xf32>, vector<8x128xf32> -> vector<8x128xf32>
    %c0_15 = arith.constant 0 : index
    %c0_16 = arith.constant 0 : index
    %17 = vector.load %arg6[%c0_15, %c0_16] : memref<1x128xf32, #tpu.memory_space<vmem>>, vector<1x128xf32>
    %18 = vector.broadcast %17 : vector<1x128xf32> to vector<8x128xf32>
    %19 = arith.addf %16, %18 : vector<8x128xf32>
    %c0_17 = arith.constant 0 : index
    %c0_18 = arith.constant 0 : index
    %20 = vector.load %arg7[%c0_17, %c0_18] : memref<8x128xf32, #tpu.memory_space<vmem>>, vector<8x128xf32>
    tpu.vector_store %arg7[%c0_17, %c0_18], %19 {strides = array<i32>} : memref<8x128xf32, #tpu.memory_space<vmem>>, vector<8x128xf32>,
    return
  }
}

</mosaic_0001>

<bundles_post_ra>
// kernel: mlp_actor_critic_forward.1
= control target key start
LH: loop header
LB: loop body
LE: loop exit
PB: predicated region body
PF: predicated region fallthrough
CT: control target
= control target key end

     0   :  { %12 = vsyncpa [#allocation3], 0  ;;  %s673_s0 = inlined_call_operand.hbm [shape: f32[8,16], index: 0, kind: input, shape index: {}]   ;;  %s674_s1 = inlined_call_operand.hbm [shape: f32[16,64], index: 1, kind: input, shape index: {}]   ;;  %s675_s2 = inlined_call_operand.vmem [shape: f32[1,64], index: 2, kind: input, shape index: {}]   ;;  %s676_s3 = inlined_call_operand.hbm [shape: f32[64,64], index: 3, kind: input, shape index: {}]   ;;  %s677_s4 = inlined_call_operand.vmem [shape: f32[1,64], index: 4, kind: input, shape index: {}]   ;;  %s678_s5 = inlined_call_operand.hbm [shape: f32[64,128], index: 5, kind: input, shape index: {}]   ;;  %s679_s6 = inlined_call_operand.vmem [shape: f32[1,128], index: 6, kind: input, shape index: {}]   ;;  %s680_s7 = inlined_call_operand.vmem [shape: f32[8,128], index: 7, kind: output, shape index: {}]  }
   0x1   :  { %13 = vsyncpa [#allocation5], 0 }
   0x2   :  { %14 = vsyncpa [#allocation8], 0  ;;  %s552_s24 = smov [#allocation4]   ;;  %s458_s28 = scalar_lea.hbm %s674_s1, 256 }
   0x3   :  { %s30_s25 = sshll.u32 %s552_s24, 4  ;;  %p459_p0 = scmp.ne.s32.totalorder %s674_s1, %s458_s28  ;;  %s31_s25 = int_to_ptr.vmem [resolvable:$true] %s30_s25 }
   0x4   :  { %p462_p1 = scmp.lt.u32.totalorder %s458_s28, %s674_s1 }
   0x6   :  { %p464_p2 = pnand %p462_p1, %p459_p0 }
   0x8   :  { %467 = shalt.err (!%p464_p2)
}
   0x9   :  { %s468_s10 = scalar_lea.vmem %s31_s25, 256  ;;  %p473_p4 = scmp.lt.s32.totalorder %s31_s25, %s31_s25 }
   0xa   :  { %p469_p3 = scmp.ne.s32.totalorder %s31_s25, %s468_s10  ;;  %p474_p5 = scmp.lt.s32.totalorder %s468_s10, %s468_s10 }
   0xc   :  { %p475_p6 = por %p474_p5, %p473_p4 }
   0xe   :  { %p476_p7 = pnand %p475_p6, %p469_p3 }
  0x10   :  { %479 = shalt.err (!%p476_p7)
}
  0x11   :  { %s553_s11 = smov 128   ;;  %s554_s12 = smov 8  }
  0x12   :  { %36 = dma.hbm_to_vmem [thread:$0]  %s674_s1, 256, %s31_s25, [#allocation5], %s553_s11, %s553_s11, %s554_s12  }
  0x13   :  { %s555_s15 = smov [#allocation2]   ;;  %s556_s17 = smov [#allocation6]  }
  0x14   :  { %s21_s16 = sshll.u32 %s555_s15, 4  ;;  %s44_s18 = sshll.u32 %s556_s17, 4  ;;  %s22_s16 = int_to_ptr.vmem [resolvable:$true] %s21_s16  ;;  %s45_s18 = int_to_ptr.vmem [resolvable:$true] %s44_s18 }
  0x15   :  { %s480_s21 = scalar_lea.hbm %s673_s0, 128 }
  0x16   :  { %p481_p8 = scmp.ne.s32.totalorder %s673_s0, %s480_s21  ;;  %p484_p9 = scmp.lt.u32.totalorder %s480_s21, %s673_s0 }
  0x18   :  { %p486_p10 = pnand %p484_p9, %p481_p8 }
  0x1a   :  { %489 = shalt.err (!%p486_p10)
}
  0x1b   :  { %s490_s1 = scalar_lea.vmem %s22_s16, 128  ;;  %p495_p12 = scmp.lt.s32.totalorder %s22_s16, %s22_s16 }
  0x1c   :  { %p491_p11 = scmp.ne.s32.totalorder %s22_s16, %s490_s1  ;;  %p496_p13 = scmp.lt.s32.totalorder %s490_s1, %s490_s1 }
  0x1e   :  { %p497_p0 = por %p496_p13, %p495_p12 }
  0x20   :  { %p498_p1 = pnand %p497_p0, %p491_p11 }
  0x22   :  { %501 = shalt.err (!%p498_p1)
}
  0x23   :  { %24 = dma.hbm_to_vmem [thread:$0]  %s673_s0, 128, %s22_s16, [#allocation3]  }
  0x24   :  { %s502_s30 = scalar_lea.hbm %s676_s3, 1024 }
  0x25   :  { %p503_p2 = scmp.ne.s32.totalorder %s676_s3, %s502_s30  ;;  %p506_p3 = scmp.lt.u32.totalorder %s502_s30, %s676_s3 }
  0x27   :  { %p508_p4 = pnand %p506_p3, %p503_p2 }
  0x29   :  { %511 = shalt.err (!%p508_p4)
}
  0x2a   :  { %s512_s14 = scalar_lea.vmem %s45_s18, 1024  ;;  %p517_p6 = scmp.lt.s32.totalorder %s45_s18, %s45_s18 }
  0x2b   :  { %p513_p5 = scmp.ne.s32.totalorder %s45_s18, %s512_s14  ;;  %p518_p7 = scmp.lt.s32.totalorder %s512_s14, %s512_s14 }
  0x2d   :  { %p519_p8 = por %p518_p7, %p517_p6 }
  0x2f   :  { %p520_p9 = pnand %p519_p8, %p513_p5 }
  0x31   :  { %523 = shalt.err (!%p520_p9)
}
  0x32   :  { %50 = dma.hbm_to_vmem [thread:$0]  %s676_s3, 1024, %s45_s18, [#allocation5], %s553_s11, %s553_s11, %s554_s12  }
  0x33   :  { %s557_s16 = smov [#allocation7]   ;;  %s524_s21 = scalar_lea.hbm %s678_s5, 1024 }
  0x34   :  { %s58_s17 = sshll.u32 %s557_s16, 4  ;;  %p525_p10 = scmp.ne.s32.totalorder %s678_s5, %s524_s21  ;;  %s59_s17 = int_to_ptr.vmem [resolvable:$true] %s58_s17 }
  0x35   :  { %p528_p11 = scmp.lt.u32.totalorder %s524_s21, %s678_s5 }
  0x37   :  { %p530_p12 = pnand %p528_p11, %p525_p10 }
  0x39   :  { %533 = shalt.err (!%p530_p12)
}
  0x3a   :  { %s534_s1 = scalar_lea.vmem %s59_s17, 1024  ;;  %p539_p0 = scmp.lt.s32.totalorder %s59_s17, %s59_s17 }
  0x3b   :  { %p535_p13 = scmp.ne.s32.totalorder %s59_s17, %s534_s1  ;;  %p540_p1 = scmp.lt.s32.totalorder %s534_s1, %s534_s1 }
  0x3d   :  { %p541_p2 = por %p540_p1, %p539_p0 }
  0x3f   :  { %p542_p3 = pnand %p541_p2, %p535_p13 }
  0x41   :  { %545 = shalt.err (!%p542_p3)
}
  0x42   :  { %64 = dma.hbm_to_vmem [thread:$0]  %s678_s5, 1024, %s59_s17, [#allocation8], %s553_s11, %s553_s11, %s554_s12  }
  0x43   :  { %546 = dma.done.wait [#allocation3], 128  }
  0x44   :  { %547 = vsyncadd [#allocation3], 4294967168 }
  0x45   :  { %548 = dma.done.wait [#allocation5], 1280  }
  0x46   :  { %549 = vsyncadd [#allocation5], 4294966016 }
  0x47   :  { %550 = dma.done.wait [#allocation8], 1024  }
  0x48   :  { %551 = vsyncadd [#allocation8], 4294966272  ;;  %v558_v0 = vmov 0.0|0.0   ;;  %vm559_vm0 = vmmov 0   ;;  %v560_v1 = vmov 0.0   ;;  %v80_v2 = vld [vmem:[#allocation4] sm:$0xff] }
  0x49   :  { %422 = vmatprep.subr.bf16.mxu0 %v558_v0  ;;  %381 = vmatprep.mubr.msk.f32.mxu0 %vm559_vm0, %v560_v1  ;;  %v81_v3 = vld [vmem:[#allocation4 + $0x8] sm:$0xff]  ;;  %v164_v5 = vld [vmem:[#allocation6] sm:$0xff]  ;;  %v165_v6 = vld [vmem:[#allocation6 + $0x8] sm:$0xff]  ;;  %vm89_vm1 = vcmask 130048   ;;  %vm179_vm2 = vcmask 523264  }
  0x4a   :  { %425 = vmatprep.subr.bf16.mxu1 %v558_v0  ;;  %400 = vmatprep.mubr.msk.f32.mxu1 %vm559_vm0, %v560_v1  ;;  %v423_v4 = vpack.c.bf16 %v81_v3, %v80_v2  ;;  %v166_v7 = vld [vmem:[#allocation6 + $0x10] sm:$0xff]  ;;  %v426_v8 = vpack.c.bf16 %v165_v6, %v164_v5  ;;  %v167_v9 = vld [vmem:[#allocation6 + $0x18] sm:$0xff]  ;;  %v79_v10 = vld [vmem:[#allocation2] sm:$0xff] }
  0x4b   :  { %v429_v11 = vpack.c.bf16 %v167_v9, %v166_v7  ;;  %v168_v12 = vld [vmem:[#allocation6 + $0x20] sm:$0xff]  ;;  %v169_v13 = vld [vmem:[#allocation6 + $0x28] sm:$0xff]  ;;  %v170_v15 = vld [vmem:[#allocation6 + $0x30] sm:$0xff] }
  0x4c   :  { %424 = vmatpush3.bf16.msra.mxu0 %v423_v4  ;;  %427 = vmatpush3.bf16.msra.mxu1 %v426_v8  ;;  %v432_v14 = vpack.c.bf16 %v169_v13, %v168_v12  ;;  %v171_v16 = vld [vmem:[#allocation6 + $0x38] sm:$0xff]  ;;  %v254_v18 = vld [vmem:[#allocation7] sm:$0xff]  ;;  %v255_v19 = vld [vmem:[#allocation7 + $0x8] sm:$0xff] }
  0x4d   :  { %437 = vmatprep.subr.bf16.mxu0 %v558_v0  ;;  %428 = vmatprep.subr.bf16.mxu1 %v558_v0  ;;  %v435_v17 = vpack.c.bf16 %v171_v16, %v170_v15  ;;  %v256_v20 = vld [vmem:[#allocation7 + $0x10] sm:$0xff]  ;;  %v438_v21 = vpack.c.bf16 %v255_v19, %v254_v18  ;;  %v257_v22 = vld [vmem:[#allocation7 + $0x18] sm:$0xff]  ;;  %v258_v24 = vld [vmem:[#allocation7 + $0x20] sm:$0xff] }
  0x4e   :  { %v441_v23 = vpack.c.bf16 %v257_v22, %v256_v20  ;;  %v259_v25 = vld [vmem:[#allocation7 + $0x28] sm:$0xff]  ;;  %v260_v32 = vld [vmem:[#allocation7 + $0x30] sm:$0xff]  ;;  %v261_v33 = vld [vmem:[#allocation7 + $0x38] sm:$0xff] }
  0x4f   :  { %382 = vmatmul.mubr.msk.f32.vlgmr.msra.gmra.mrb[0].mxu0 %vm89_vm1, %v79_v10  ;;  %v444_v26 = vpack.c.bf16 %v259_v25, %v258_v24  ;;  %v350_v27 = vld [vmem:[%s675_s2] ss:$0 sm:$0xff]  ;;  %v447_v34 = vpack.c.bf16 %v261_v33, %v260_v32 }
  0x50   :  { %419 = vmatprep.mubr.msk.f32.mxu0 %vm559_vm0, %v560_v1  ;;  %430 = vmatpush3.bf16.msra.mxu1 %v429_v11  ;;  %v352_v35 = vld [vmem:[%s677_s4] ss:$0 sm:$0xff] }
  0x51   :  { %431 = vmatprep.subr.bf16.mxu1 %v558_v0  ;;  %439 = vmatpush3.bf16.msra.mxu0 %v438_v21  ;;  %v354_v40 = vld [vmem:[%s679_s6] ss:$0 sm:$0xff] }
  0x52   :  { %440 = vmatprep.subr.bf16.mxu0 %v558_v0 }
  0x54   :  { %433 = vmatpush3.bf16.msra.mxu1 %v432_v14 }
  0x55   :  { %434 = vmatprep.subr.bf16.mxu1 %v558_v0  ;;  %442 = vmatpush3.bf16.msra.mxu0 %v441_v23 }
  0x56   :  { %443 = vmatprep.subr.bf16.mxu0 %v558_v0 }
  0x58   :  { %436 = vmatpush3.bf16.msra.mxu1 %v435_v17 }
  0x59   :  { %445 = vmatpush3.bf16.msra.mxu0 %v444_v26 }
  0x5a   :  { %446 = vmatprep.subr.bf16.mxu0 %v558_v0 }
  0x5d   :  { %448 = vmatpush3.bf16.msra.mxu0 %v447_v34 }
 0x122   :  { %v159_v28 = vpop.f32.mrb[0].mxu0 }
 0x123   :  { %v160_v29 = vadd.f32 %v350_v27, %v159_v28  ;;  %v383_v30 = vpop.f32.mrb[1].mxu0 }
 0x125   :  { %v163_v31 = vmax.f32 %v160_v29, 0.0 }
 0x127   :  { %401 = vmatmul.mubr.msk.f32.vlgmr.msra.gmra.mrb[0].mxu1 %vm179_vm2, %v163_v31 }
 0x1fa   :  { %v249_v36 = vpop.f32.mrb[0].mxu1 }
 0x1fb   :  { %v250_v37 = vadd.f32 %v352_v35, %v249_v36  ;;  %v402_v38 = vpop.f32.mrb[1].mxu1 }
 0x1fd   :  { %v253_v39 = vmax.f32 %v250_v37, 0.0 }
 0x1ff   :  { %420 = vmatmul.mubr.msk.f32.vlgmr.msra.gmra.mrb[2].mxu0 %vm179_vm2, %v253_v39 }
 0x2d2   :  { %v338_v41 = vpop.f32.mrb[2].mxu0 }
 0x2d3   :  { %v339_v42 = vadd.f32 %v354_v40, %v338_v41  ;;  %v421_v43 = vpop.f32.mrb[3].mxu0 }
 0x2d5   :  { %342 = vst [vmem:[%s680_s7] sm:$0xff] %v339_v42 }
 0x2d6   :  { %347 = vsyncpa [#allocation3], 1 }
 0x2d7   :  { %348 = vsyncpa [#allocation5], 1 }
 0x2d8   :  { %349 = vsyncpa [#allocation8], 1 }

</bundles_post_ra>
